<compile_context>
chip_gen: v6e
topology: v6e:2x2x1
jax: 0.10.0
libtpu: 0.0.40
codegen_flags: <defaults>
</compile_context>

<pallas_src>
import jax
import jax.numpy as jnp
from jax import lax
from jax.experimental import pallas as pl
from jax.experimental.pallas import tpu as pltpu

S = 10       # tokens / queries (hardcoded range(10) and .view(1, 6, 10) in the module)
F = 6        # feature dim (nn.Linear(6, 6))
W = 16       # padded lane width: covers F+1=7 (x / fused-A block) and S=10 (vsum row)
W_ROW0 = 16  # sublane offset of the fused (W, W) weight block inside each problem slab
R = 32       # padded sublane rows per slab: [x_pad: 0..9 | vsum: 10 | pad | w: 16..31]


def _attention_kernel(fused_ref, o_ref):
    """fused_ref: (1, R, W) per-problem slab;  o_ref: (1, S, 1) output column."""
    data = fused_ref[0]                              # (R, W): one ~2 KiB load
    xp   = data[0:S, :]                              # (S, W)  [1 | x | 0-pad]
    vrow = data[S:S + 1, :]                          # (1, W)  vsum_j on lanes 0..S-1
    w    = data[W_ROW0:W_ROW0 + W, :]                # (W, W)  fused bilinear form

    # MXU #1: proj[i, b] = d[b-1] + x_i · A[:, b-1]  (zero in padded columns).
    proj = jnp.dot(xp, w, preferred_element_type=jnp.float32)             # (S, W)

    # MXU #2: scores[i, j] = Q[i]·K[j] + (per-row-i constant)  -- softmax-invariant.
    # Contract the last axes of both operands: no transpose is ever materialized.
    scores = lax.dot_general(
        proj, xp, dimension_numbers=(((1,), (1,)), ((), ())),
        preferred_element_type=jnp.float32)                               # (S, S)

    m = jnp.max(scores, axis=-1, keepdims=True)                           # XLU
    p = jnp.exp(scores - m)                                               # EUP

    # No third MXU push: weighted sum + softmax denominator as VPU mul + XLU reductions.
    num = jnp.sum(p * vrow[:, 0:S], axis=-1, keepdims=True)               # (S, 1)
    den = jnp.sum(p, axis=-1, keepdims=True)                              # (S, 1)

    # Exact division keeps the 1e-4 tolerance.
    o_ref[0] = (num / den).astype(o_ref.dtype)


def _fold_params(wk, bk, wq, bq, wv, bv):
    """Host-side (jit-constant-foldable) weight folding."""
    f32 = jnp.float32
    # Q[i]·K[j] = x_i (Wq^T Wk) x_j^T + (bq Wk)·x_j + per-query-row constants (dropped).
    A = (wq.T @ wk).astype(f32)                     # (F, F)
    d = (bq @ wk).astype(f32)                       # (F,)
    w_fused = jnp.zeros((W, W), f32)
    w_fused = w_fused.at[0, 1:F + 1].set(d)         # hit by the leading 1-column of x_pad
    w_fused = w_fused.at[1:F + 1, 1:F + 1].set(A)   # hit by x
    # Output only needs vsum[j] = sum_f V[j, f]  ->  V projection collapses to a vector.
    wv_colsum = wv.sum(axis=0).astype(f32)          # (F,)
    bv_sum = bv.sum().astype(f32)                   # scalar
    return w_fused, wv_colsum, bv_sum


def attention_forward_batched(x, wk, bk, wq, bq, wv, bv):
    """x: (B, S, F) batch of independent (10, 6) problems sharing one set of weights."""
    f32 = jnp.float32
    x = x.astype(f32)
    B = x.shape[0]

    w_fused, wv_colsum, bv_sum = _fold_params(wk, bk, wq, bq, wv, bv)

    # Per-problem slab (R, W), fully fused -> exactly ONE input DMA per grid step:
    #   rows 0..S-1 : [1 | x_i | 0]   homogeneous coords carry the biases through the MXU
    #   row  S      : vsum_j = x_j·wv_colsum + bv_sum   (lane-oriented, lanes 0..S-1)
    #   rows 16..31 : fused (W, W) weight block (replicated per problem; ~1 KiB each)
    xp = jnp.concatenate(
        [jnp.ones((B, S, 1), f32), x, jnp.zeros((B, S, W - F - 1), f32)], axis=-1)
    vrow = x @ wv_colsum + bv_sum                                         # (B, S)
    vrow = jnp.concatenate([vrow, jnp.zeros((B, W - S), f32)], axis=-1)[:, None, :]
    pad = jnp.zeros((B, W_ROW0 - S - 1, W), f32)
    w_rep = jnp.broadcast_to(w_fused, (B, W, W))
    fused = jnp.concatenate([xp, vrow, pad, w_rep], axis=1)               # (B, R, W)

    cost = pl.CostEstimate(
        flops=B * (2 * S * W * W + 2 * S * S * W + 6 * S * S),
        transcendentals=B * S * S,
        bytes_accessed=B * (R * W + S) * 4,
    )

    out_col = pl.pallas_call(
        _attention_kernel,
        out_shape=jax.ShapeDtypeStruct((B, S, 1), f32),
        grid_spec=pltpu.PrefetchScalarGridSpec(
            num_scalar_prefetch=0,
            grid=(B,),
            in_specs=[pl.BlockSpec((1, R, W), lambda b: (b, 0, 0))],
            out_specs=pl.BlockSpec((1, S, 1), lambda b: (b, 0, 0)),
        ),
        compiler_params=pltpu.CompilerParams(
            dimension_semantics=("parallel",)),   # shards the batch across v7x's 2 TCs
        cost_estimate=cost,
    )(fused)

    # Layout fix-up outside the kernel (free): (B, S, 1) -> (B, 1, S).
    return out_col.reshape(B, 1, S)


def attention_forward(x, wk, bk, wq, bq, wv, bv):
    """Exact module semantics: (10, 6) input -> (1, 10) output."""
    return attention_forward_batched(x[None], wk, bk, wq, bq, wv, bv)[0]


def _reference(x, wk, bk, wq, bq, wv, bv):
    k = x @ wk.T + bk
    q = x @ wq.T + bq
    v = x @ wv.T + bv
    a = jax.nn.softmax(q @ k.T, axis=-1)
    return jnp.sum(a @ v, axis=1).reshape(1, -1)


if __name__ == "__main__":
    key = jax.random.PRNGKey(0)
    kx, kk, kbk, kq, kbq, kv, kbv, ko, kbo, kxb = jax.random.split(key, 10)

    bound = 1.0 / jnp.sqrt(jnp.float32(F))  # PyTorch nn.Linear default uniform bound

    x = jax.random.normal(kx, (S, F), dtype=jnp.float32)
    wk = jax.random.uniform(kk, (F, F), jnp.float32, -bound, bound)
    bk = jax.random.uniform(kbk, (F,), jnp.float32, -bound, bound)
    wq = jax.random.uniform(kq, (F, F), jnp.float32, -bound, bound)
    bq = jax.random.uniform(kbq, (F,), jnp.float32, -bound, bound)
    wv = jax.random.uniform(kv, (F, F), jnp.float32, -bound, bound)
    bv = jax.random.uniform(kbv, (F,), jnp.float32, -bound, bound)
    # self.out = nn.Linear(6, 1): initialized but unused in the PyTorch forward.
    w_out = jax.random.uniform(ko, (1, F), jnp.float32, -bound, bound)
    b_out = jax.random.uniform(kbo, (1,), jnp.float32, -bound, bound)

    # Single-problem forward (the module's actual semantics).
    out = jax.block_until_ready(attention_forward(x, wk, bk, wq, bq, wv, bv))
    ref = _reference(x, wk, bk, wq, bq, wv, bv)
    assert out.shape == (1, S)
    assert jnp.allclose(out, ref, atol=1e-4, rtol=1e-4)

    # Batched path: many independent (10, 6) problems amortized into ONE pallas_call.
    B = 8
    xb = jax.random.normal(kxb, (B, S, F), dtype=jnp.float32)
    outb = jax.block_until_ready(attention_forward_batched(xb, wk, bk, wq, bq, wv, bv))
    refb = jnp.stack([_reference(xb[b], wk, bk, wq, bq, wv, bv) for b in range(B)])
    assert outb.shape == (B, 1, S)
    assert jnp.allclose(outb, refb, atol=1e-4, rtol=1e-4)

    print("KERNEL_OK")
</pallas_src>

<mosaic_0001>
module attributes {stable_mosaic.version = 11 : i64} {
  func.func @_attention_kernel(%arg0: i32, %arg1: memref<1x32x16xf32, #tpu.memory_space<vmem>>, %arg2: memref<1x10x1xf32, #tpu.memory_space<vmem>>) attributes {dimension_semantics = [#tpu.dimension_semantics<parallel>], iteration_bounds = array<i64: 1>, scalar_prefetch = 0 : i64, scratch_operands = 0 : i64, tpu.core_type = #tpu.core_type<tc>, window_params = [{transform_indices = @transform_0, window_bounds = array<i64: 1, 32, 16>}, {transform_indices = @transform_1, window_bounds = array<i64: 1, 10, 1>}]} {
    %c0 = arith.constant 0 : index
    %c0_0 = arith.constant 0 : index
    %c0_1 = arith.constant 0 : index
    %0 = vector.load %arg1[%c0, %c0_0, %c0_1] : memref<1x32x16xf32, #tpu.memory_space<vmem>>, vector<1x32x16xf32>
    %1 = vector.shape_cast %0 : vector<1x32x16xf32> to vector<32x16xf32>
    %2 = vector.extract_strided_slice %1 {offsets = [0, 0], sizes = [10, 16], strides = [1, 1]} : vector<32x16xf32> to vector<10x16xf32>
    %3 = vector.extract_strided_slice %1 {offsets = [10, 0], sizes = [1, 16], strides = [1, 1]} : vector<32x16xf32> to vector<1x16xf32>
    %4 = vector.extract_strided_slice %1 {offsets = [16, 0], sizes = [16, 16], strides = [1, 1]} : vector<32x16xf32> to vector<16x16xf32>
    %cst = arith.constant dense<0.000000e+00> : vector<10x16xf32>
    %5 = tpu.matmul %2, %4, %cst {dimension_numbers = #tpu.dot_dimension_numbers<[1], [0], [0], [1], [0, 0, 1, 1], [], []>} : vector<10x16xf32>, vector<16x16xf32>, vector<10x16xf32> -> vector<10x16xf32>
    %cst_2 = arith.constant dense<0.000000e+00> : vector<10x10xf32>
    %6 = tpu.matmul %5, %2, %cst_2 {dimension_numbers = #tpu.dot_dimension_numbers<[1], [1], [0], [0], [0, 0, 1, 0], [], []>} : vector<10x16xf32>, vector<10x16xf32>, vector<10x10xf32> -> vector<10x10xf32>
    %cst_3 = arith.constant dense<0xFF800000> : vector<10xf32>
    %7 = vector.multi_reduction <maximumf>, %6, %cst_3 [1] : vector<10x10xf32> to vector<10xf32>
    %8 = vector.shape_cast %7 : vector<10xf32> to vector<10x1xf32>
    %9 = vector.broadcast %8 : vector<10x1xf32> to vector<10x10xf32>
    %10 = arith.subf %6, %9 : vector<10x10xf32>
    %11 = math.exp %10 : vector<10x10xf32>
    %12 = vector.extract_strided_slice %3 {offsets = [0, 0], sizes = [1, 10], strides = [1, 1]} : vector<1x16xf32> to vector<1x10xf32>
    %13 = vector.broadcast %12 : vector<1x10xf32> to vector<10x10xf32>
    %14 = arith.mulf %11, %13 : vector<10x10xf32>
    %cst_4 = arith.constant dense<0.000000e+00> : vector<10xf32>
    %15 = vector.multi_reduction <add>, %14, %cst_4 [1] : vector<10x10xf32> to vector<10xf32>
    %16 = vector.shape_cast %15 : vector<10xf32> to vector<10x1xf32>
    %cst_5 = arith.constant dense<0.000000e+00> : vector<10xf32>
    %17 = vector.multi_reduction <add>, %11, %cst_5 [1] : vector<10x10xf32> to vector<10xf32>
    %18 = vector.shape_cast %17 : vector<10xf32> to vector<10x1xf32>
    %19 = arith.divf %16, %18 : vector<10x1xf32>
    %c0_6 = arith.constant 0 : index
    %c0_7 = arith.constant 0 : index
    %c0_8 = arith.constant 0 : index
    %20 = vector.load %arg2[%c0_6, %c0_7, %c0_8] : memref<1x10x1xf32, #tpu.memory_space<vmem>>, vector<1x10x1xf32>
    %21 = vector.shape_cast %20 : vector<1x10x1xf32> to vector<10x1xf32>
    %22 = vector.shape_cast %19 : vector<10x1xf32> to vector<1x10x1xf32>
    tpu.vector_store %arg2[%c0_6, %c0_7, %c0_8], %22 {strides = array<i32>} : memref<1x10x1xf32, #tpu.memory_space<vmem>>, vector<1x10x1xf32>,
    return
  }
  func.func @transform_0(%arg0: i32) -> (i32, i32, i32) {
    %c0_i32 = arith.constant 0 : i32
    %c0_i32_0 = arith.constant 0 : i32
    %c0_i32_1 = arith.constant 0 : i32
    return %arg0, %c0_i32, %c0_i32_0 : i32, i32, i32
  }
  func.func @transform_1(%arg0: i32) -> (i32, i32, i32) {
    %c0_i32 = arith.constant 0 : i32
    %c0_i32_0 = arith.constant 0 : i32
    %c0_i32_1 = arith.constant 0 : i32
    return %arg0, %c0_i32, %c0_i32_0 : i32, i32, i32
  }
}

</mosaic_0001>

<bundles_post_ra>
// kernel: tpu_custom_call.1
= control target key start
LH: loop header
LB: loop body
LE: loop exit
PB: predicated region body
PF: predicated region fallthrough
CT: control target
= control target key end

     0   :  { %vm12_vm0 = vcmask 130048   ;;  %vm175_vm1 = vcmask 80896   ;;  %vm179_vm2 = vcmask 74752   ;;  %v189_v13 = vlaneseq  ;;  %s297_s0 = inlined_call_operand.vmem [shape: f32[1,32,16], index: 0, kind: input, shape index: {}]   ;;  %s298_s1 = inlined_call_operand.vmem [shape: f32[1,10,1], index: 1, kind: output, shape index: {}]  }
   0x1   :  { %v11_v0 = vld [vmem:[%s297_s0 + $0x18] sm:$0xff]  ;;  %v10_v1 = vld [vmem:[%s297_s0 + $0x10] sm:$0xff]  ;;  %v8_v2 = vld [vmem:[%s297_s0] sm:$0xff]  ;;  %vm211_vm3 = vcmask 7168   ;;  %vm213_vm4 = vcmask 1024  }
   0x2   :  { %233 = vmatprep.subr.mxu0 %v11_v0  ;;  %237 = vmatprep.mubr.msk.f32.mxu0 %vm12_vm0, %v8_v2  ;;  %v9_v3 = vld [vmem:[%s297_s0 + $0x8] sm:$0xff]  ;;  %v190_v17 = vshrl.u32 %v189_v13, 7 }
   0x3   :  { %234 = vmatpush3.msra.mxu0 %v11_v0  ;;  %240 = vmatprep.subr.msk.mxu1 %vm12_vm0, %v9_v3 }
   0x4   :  { %235 = vmatprep.subr.mxu0 %v10_v1  ;;  %241 = vmatpush3.xpose.msk.msra.mxu1 %vm12_vm0, %v9_v3  ;;  %v191_v18 = vsub.s32 2, %v190_v17 }
   0x5   :  { %236 = vmatpush3.msra.mxu0 %v10_v1  ;;  %242 = vmatprep.subr.msk.mxu1 %vm12_vm0, %v8_v2 }
   0x6   :  { %238 = vmatmul.mubr.msk.f32.vlgmr.msra.gmra.mxu0 %vm12_vm0, %v9_v3  ;;  %v192_v19 = vrot.slane %v9_v3, %v191_v18 }
   0x8   :  { %243 = vmatpush3.xpose.msk.msra.mxu1 %vm12_vm0, %v8_v2 }
  0xc6   :  { %v239_v4 = vpop.f32.mrf.mxu0 }
  0xc8   :  { %v85_v5 = vpop.f32.mrf.mxu0 }
  0xc9   :  { %244 = vmatprep.mubr.msk.f32.mxu1 %vm12_vm0, %v85_v5 }
  0xca   :  { %245 = vmatmul.mubr.msk.f32.vlgmr.msra.gmra.mxu1 %vm12_vm0, %v239_v4 }
 0x18a   :  { %v246_v6 = vpop.f32.mrf.mxu1 }
 0x18b   :  { %v180_v9 = vsel %vm179_vm2, %v246_v6, -inf }
 0x18c   :  { %v166_v7 = vpop.f32.mrf.mxu1 }
 0x18d   :  { %v176_v8 = vsel %vm175_vm1, %v166_v7, -inf }
 0x18e   :  { %177 = vmax.xlane.f32.xlu0 %v176_v8 }
 0x192   :  { %181 = vmax.xlane.f32.xlu0 %v180_v9 }
 0x217   :  { %v178_v10 = vpop.xlane.xlu0 %177 }
 0x218   :  { %v183_v11 = vsub.f32 %v166_v7, %v178_v10 }
 0x21a   :  { %v185_v12 = vmul.f32 1.442695, %v183_v11 }
 0x21b   :  { %v182_v14 = vpop.xlane.xlu0 %181 }
 0x21c   :  { %247 = vpow2.f32 %v185_v12  ;;  %v184_v15 = vsub.f32 %v246_v6, %v182_v14 }
 0x21e   :  { %v187_v16 = vmul.f32 1.442695, %v184_v15 }
 0x220   :  { %249 = vpow2.f32 %v187_v16 }
 0x229   :  { %v248_v20 = vpop.eup %247 }
 0x22a   :  { %v201_v21 = vsel %vm175_vm1, %v248_v20, 0.0  ;;  %v193_v22 = vmul.f32 %v248_v20, %v192_v19 }
 0x22b   :  { %202 = vadd.xlane.f32.xlu1 %v201_v21 }
 0x22c   :  { %v195_v23 = vsel %vm175_vm1, %v193_v22, 0.0 }
 0x22d   :  { %v250_v24 = vpop.eup %249  ;;  %196 = vadd.xlane.f32.xlu0 %v195_v23 }
 0x22e   :  { %v204_v25 = vsel %vm179_vm2, %v250_v24, 0.0  ;;  %v194_v26 = vmul.f32 %v250_v24, %v192_v19 }
 0x22f   :  { %205 = vadd.xlane.f32.xlu1 %v204_v25 }
 0x230   :  { %v198_v27 = vsel %vm179_vm2, %v194_v26, 0.0 }
 0x233   :  { %199 = vadd.xlane.f32.xlu1 %v198_v27 }
 0x2b4   :  { %v203_v28 = vpop.xlane.xlu1 %202 }
 0x2b5   :  { %251 = vrcp.f32 %v203_v28 }
 0x2b6   :  { %v197_v31 = vpop.xlane.xlu0 %196 }
 0x2b8   :  { %v206_v29 = vpop.xlane.xlu1 %205 }
 0x2b9   :  { %253 = vrcp.f32 %v206_v29 }
 0x2bc   :  { %v200_v34 = vpop.xlane.xlu1 %199 }
 0x2c2   :  { %v252_v30 = vpop.eup %251 }
 0x2c3   :  { %v208_v32 = vmul.f32 %v252_v30, %v197_v31 }
 0x2c5   :  { %212 = vst.msk [vmem:[%s298_s1] sm:$0xff] %vm211_vm3, %v208_v32 }
 0x2c6   :  { %v254_v33 = vpop.eup %253 }
 0x2c7   :  { %v210_v35 = vmul.f32 %v254_v33, %v200_v34 }
 0x2c9   :  { %214 = vst.msk [vmem:[%s298_s1 + $0x8] sm:$0x3] %vm213_vm4, %v210_v35 }

</bundles_post_ra>
